<compile_context>
chip_gen: v7x
topology: tpu7x:2x2x1
jax: 0.10.0
libtpu: 0.0.40
codegen_flags: <defaults>
</compile_context>

<pallas_src>
import math
import jax
import jax.numpy as jnp
from jax.experimental import pallas as pl
from jax.experimental.pallas import tpu as pltpu


def _round_up(x, m):
    return ((x + m - 1) // m) * m


def _cdiv(a, b):
    return -(-a // b)


# ---------------------------------------------------------------------------
# Kernel: one row tile of (B*N) rows.
#   x_ref     : (TR, D)   pooled prompt embedding rows (mxu_dtype)
#   xw_t_ref  : (D, D)    x_proj weight, pre-transposed (mxu_dtype)
#   xb_ref    : (1, D)    x_proj bias (f32)
#   key_t_ref : (D, M)    keyMatrix^T (mxu_dtype)
#   rhs_ref   : (M, Wp)   [memMatrix | mem_label | I_M | 0-pad] (mxu_dtype)
#   out_ref   : (TR, Wp)  [mem_ret | gate | att | 0] (out_dtype), 128-lane store
# ---------------------------------------------------------------------------
def _gating_kernel(x_ref, xw_t_ref, xb_ref, key_t_ref, rhs_ref, out_ref):
    # x_query = tanh(Linear(x)); f32 accumulation, f32 elementwise math
    # (required on v5e anyway -- no bf16 VPU/EUP there).
    xq = jnp.tanh(
        jnp.dot(x_ref[...], xw_t_ref[...], preferred_element_type=jnp.float32)
        + xb_ref[...]
    )                                                           # (TR, D) f32
    xq = xq.astype(key_t_ref.dtype)

    # att_weight = softmax(x_query @ keyMatrix^T, axis=-1)
    logits = jnp.dot(xq, key_t_ref[...],
                     preferred_element_type=jnp.float32)        # (TR, M) f32
    logits = logits - jnp.max(logits, axis=-1, keepdims=True)
    p = jnp.exp(logits)
    inv = pl.reciprocal(jnp.sum(p, axis=-1, keepdims=True), approx=True)  # EUP
    att = p * inv                                               # (TR, M) f32

    # Single fused retrieval matmul:
    #   att @ [memMatrix | mem_label | I_M | 0] = [mem_ret | gate | att | 0]
    att = att.astype(rhs_ref.dtype)
    out = jnp.dot(att, rhs_ref[...], preferred_element_type=jnp.float32)
    out_ref[...] = out.astype(out_ref.dtype)


# ---------------------------------------------------------------------------
# One-time parameter preparation (do NOT call per forward step).
# ---------------------------------------------------------------------------
def prepare_gating_params(params, mxu_dtype=jnp.bfloat16, out_dtype=jnp.bfloat16):
    """Pre-transpose weights, hoist mem_label, build the fused lane-dense rhs."""
    memMatrix = params["memMatrix"].astype(jnp.float32)   # (M, D)
    keyMatrix = params["keyMatrix"].astype(jnp.float32)   # (M, D)
    w_gate = params["w_gate"].astype(jnp.float32)         # (D, E)
    M, D = memMatrix.shape
    E = w_gate.shape[1]

    # Batch-independent gating labels (eval mode: noise_stddev == 0).
    mem_label = jax.nn.softmax(memMatrix @ w_gate, axis=-1)          # (M, E)

    # Fused rhs, padded to a multiple of 128 lanes for an unmasked store.
    W = D + E + M
    Wp = _round_up(W, 128)
    rhs = jnp.zeros((M, Wp), jnp.float32)
    rhs = rhs.at[:, :D].set(memMatrix)
    rhs = rhs.at[:, D:D + E].set(mem_label)
    rhs = rhs.at[:, D + E:W].set(jnp.eye(M, dtype=jnp.float32))      # att passthrough

    return dict(
        xw_t=params["x_proj_w"].T.astype(mxu_dtype),        # (D, D)
        xb=params["x_proj_b"].reshape(1, D).astype(jnp.float32),
        key_t=keyMatrix.T.astype(mxu_dtype),                # (D, M)
        rhs=rhs.astype(mxu_dtype),                          # (M, Wp)
        mem_label=mem_label,                                # (M, E) f32
        out_dtype=out_dtype,
        dims=(D, M, E, Wp),
    )


# ---------------------------------------------------------------------------
# Forward (eval mode).  Mirrors MemoryGating_class.forward's return structure.
# ---------------------------------------------------------------------------
def memory_gating_forward(prop_embed, adap_embed, prepared):
    del adap_embed  # unused by the reference forward as well
    B, T, N, D = prop_embed.shape
    D_p, M, E, Wp = prepared["dims"]
    assert D == D_p, "memory dimension mismatch"
    mxu_dtype = prepared["xw_t"].dtype
    out_dtype = prepared["out_dtype"]

    BN = B * N
    # Mean over T: single XLA reduction; keeps the Pallas row grid dense and
    # avoids pulling a T-sized block into VMEM per grid step.
    x = jnp.mean(prop_embed.astype(jnp.float32), axis=1).reshape(BN, D)
    x = x.astype(mxu_dtype)

    # Row tiling.  bf16 packs two rows per sublane -> align to 16.
    row_align = 16 if jnp.dtype(mxu_dtype).itemsize < 4 else 8
    if BN <= 512:
        TR = _round_up(BN, row_align)                       # single tile
    else:
        # Big tiles to amortize ~0.35us/step, but >=2-4 tiles so v7x can shard
        # them across its two TensorCores.  VMEM is a non-issue at TR=2048
        # (~3 MiB double-buffered in+out, far under 32/64/128 MiB).
        TR = min(2048, max(256, _round_up(_cdiv(BN, 4), row_align)))
    grid = (_cdiv(BN, TR),)   # ragged trailing block handled by Pallas (no pad)

    # Advisory cost estimate so XLA schedules/overlaps this small op sensibly.
    in_isz = jnp.dtype(mxu_dtype).itemsize
    out_isz = jnp.dtype(out_dtype).itemsize
    cost = pl.CostEstimate(
        flops=int(2 * BN * (D * D + D * M + M * Wp)),
        transcendentals=int(BN * (D + M + 1)),               # tanh + exp + rcp
        bytes_accessed=int(BN * D * in_isz + BN * Wp * out_isz
                           + (D * D + D * M + M * Wp) * in_isz + D * 4),
    )

    out = pl.pallas_call(
        _gating_kernel,
        out_shape=jax.ShapeDtypeStruct((BN, Wp), out_dtype),
        grid_spec=pltpu.PrefetchScalarGridSpec(
            num_scalar_prefetch=0,
            grid=grid,
            in_specs=[
                pl.BlockSpec((TR, D), lambda r: (r, 0)),    # x rows
                pl.BlockSpec((D, D), lambda r: (0, 0)),     # x_proj weight^T
                pl.BlockSpec((1, D), lambda r: (0, 0)),     # x_proj bias
                pl.BlockSpec((D, M), lambda r: (0, 0)),     # keyMatrix^T
                pl.BlockSpec((M, Wp), lambda r: (0, 0)),    # fused rhs
            ],
            out_specs=pl.BlockSpec((TR, Wp), lambda r: (r, 0)),
        ),
        compiler_params=pltpu.CompilerParams(
            # No output block is revisited -> row tiles are embarrassingly
            # parallel (shards across v7x's two TensorCores).
            dimension_semantics=("parallel",),
        ),
        cost_estimate=cost,
    )(x, prepared["xw_t"], prepared["xb"], prepared["key_t"], prepared["rhs"])

    # Split the fused slab; cast up after slicing (callers expect f32).
    mem_retrieved = out[:, :D].astype(jnp.float32).reshape(B, N, D)
    label_retrieved = out[:, D:D + E].astype(jnp.float32).reshape(B, N, E)
    att_weight = out[:, D + E:D + E + M].astype(jnp.float32).reshape(B, N, M)
    gate = label_retrieved
    return gate, (mem_retrieved, label_retrieved, prepared["mem_label"],
                  None, att_weight)


# ---------------------------------------------------------------------------
# Deterministic parameter init (mirrors MemoryGating_class.initialize_weights).
# ---------------------------------------------------------------------------
def init_params(key, memory_dim, num_memory, n_experts):
    D, M, E = memory_dim, num_memory, n_experts
    k1, k2, k3, k4, k5 = jax.random.split(key, 5)
    memMatrix = 0.02 * jax.random.truncated_normal(k1, -2.0, 2.0, (M, D), jnp.float32)
    keyMatrix = 0.02 * jax.random.truncated_normal(k2, -2.0, 2.0, (M, D), jnp.float32)
    bound_g = 1.0 / math.sqrt(E)                       # kaiming_uniform_(a=sqrt(5))
    w_gate = jax.random.uniform(k3, (D, E), jnp.float32, -bound_g, bound_g)
    w_noise = jax.random.uniform(k4, (D, E), jnp.float32, -bound_g, bound_g)  # eval: unused
    bound_x = math.sqrt(6.0 / (D + D))                 # xavier_uniform_
    x_proj_w = jax.random.uniform(k5, (D, D), jnp.float32, -bound_x, bound_x)
    x_proj_b = jnp.zeros((D,), jnp.float32)
    return dict(memMatrix=memMatrix, keyMatrix=keyMatrix, w_gate=w_gate,
                w_noise=w_noise, x_proj_w=x_proj_w, x_proj_b=x_proj_b)


def reference_forward(prop_embed, params):
    """Pure-JAX f32 reference (mirrors the PyTorch eval-mode math)."""
    x = jnp.mean(prop_embed, axis=1)
    xq = jnp.tanh(x @ params["x_proj_w"].T + params["x_proj_b"])
    att = jax.nn.softmax(xq @ params["keyMatrix"].T, axis=-1)
    mem_label = jax.nn.softmax(params["memMatrix"] @ params["w_gate"], axis=-1)
    mem_ret = att @ params["memMatrix"]
    label_ret = att @ mem_label
    return label_ret, mem_ret, mem_label, att


if __name__ == "__main__":
    # Small synthetic config consistent with the module:
    #   memory_dim=32, num_memory=16, n_experts=4; prop_embed: (B=2, T=4, N=8, D=32)
    B, T, N = 2, 4, 8
    memory_dim, num_memory, n_experts = 32, 16, 4

    key = jax.random.PRNGKey(0)
    k_prop, k_adap, k_params = jax.random.split(key, 3)
    prop_embed = jax.random.normal(k_prop, (B, T, N, memory_dim), jnp.float32)
    adap_embed = jax.random.normal(k_adap, (B, T, N, memory_dim), jnp.float32)  # unused
    params = init_params(k_params, memory_dim, num_memory, n_experts)

    ref_gate, ref_mem_ret, ref_mem_label, ref_att = reference_forward(prop_embed, params)

    # --- f32 operands + f32 slab: semantics-faithful check (tolerance covers
    #     the EUP approximate reciprocal and XLA matmul precision defaults). ---
    prep_f32 = prepare_gating_params(params, mxu_dtype=jnp.float32,
                                     out_dtype=jnp.float32)
    gate, (mem_ret, label_ret, mem_label, _, att) = memory_gating_forward(
        prop_embed, adap_embed, prep_f32)
    jax.block_until_ready((gate, mem_ret, mem_label, att))

    assert jnp.allclose(gate, ref_gate, atol=5e-3, rtol=5e-3), "gate mismatch (f32)"
    assert jnp.allclose(mem_ret, ref_mem_ret, atol=5e-3, rtol=5e-3), "mem_retrieved mismatch (f32)"
    assert jnp.allclose(mem_label, ref_mem_label, atol=1e-5, rtol=1e-5), "mem_label mismatch"
    assert jnp.allclose(att, ref_att, atol=5e-3, rtol=5e-3), "att_weight mismatch (f32)"

    # --- Default fast path: bf16 MXU operands (all TPU generations, incl. v5e)
    #     and a bf16 output slab (halved writeback); f32 accumulation and f32
    #     elementwise math, so only operand/output rounding widens tolerance. ---
    prep_bf16 = prepare_gating_params(params)   # bf16 operands, bf16 slab
    gate16, (mem_ret16, _, _, _, att16) = memory_gating_forward(
        prop_embed, adap_embed, prep_bf16)
    jax.block_until_ready((gate16, mem_ret16, att16))

    assert jnp.allclose(gate16, ref_gate, atol=1e-2, rtol=5e-2), "gate mismatch (bf16)"
    assert jnp.allclose(mem_ret16, ref_mem_ret, atol=1e-2, rtol=5e-2), "mem_retrieved mismatch (bf16)"
    assert jnp.allclose(att16, ref_att, atol=1e-2, rtol=5e-2), "att_weight mismatch (bf16)"

    print("KERNEL_OK")
</pallas_src>

<mosaic_0001>
module attributes {stable_mosaic.version = 11 : i64} {
  func.func @_gating_kernel(%arg0: i32, %arg1: memref<16x32xf32, #tpu.memory_space<vmem>>, %arg2: memref<32x32xf32, #tpu.memory_space<vmem>>, %arg3: memref<1x32xf32, #tpu.memory_space<vmem>>, %arg4: memref<32x16xf32, #tpu.memory_space<vmem>>, %arg5: memref<16x128xf32, #tpu.memory_space<vmem>>, %arg6: memref<16x128xf32, #tpu.memory_space<vmem>>) attributes {dimension_semantics = [#tpu.dimension_semantics<parallel>], iteration_bounds = array<i64: 1>, scalar_prefetch = 0 : i64, scratch_operands = 0 : i64, tpu.core_type = #tpu.core_type<tc>, window_params = [{transform_indices = @transform_0, window_bounds = array<i64: 16, 32>}, {pipeline_mode = #tpu.pipeline_mode<synchronous>, transform_indices = @transform_1, window_bounds = array<i64: 32, 32>}, {pipeline_mode = #tpu.pipeline_mode<synchronous>, transform_indices = @transform_2, window_bounds = array<i64: 1, 32>}, {pipeline_mode = #tpu.pipeline_mode<synchronous>, transform_indices = @transform_3, window_bounds = array<i64: 32, 16>}, {pipeline_mode = #tpu.pipeline_mode<synchronous>, transform_indices = @transform_4, window_bounds = array<i64: 16, 128>}, {transform_indices = @transform_5, window_bounds = array<i64: 16, 128>}]} {
    %c0 = arith.constant 0 : index
    %c0_0 = arith.constant 0 : index
    %0 = vector.load %arg1[%c0, %c0_0] : memref<16x32xf32, #tpu.memory_space<vmem>>, vector<16x32xf32>
    %c0_1 = arith.constant 0 : index
    %c0_2 = arith.constant 0 : index
    %1 = vector.load %arg2[%c0_1, %c0_2] : memref<32x32xf32, #tpu.memory_space<vmem>>, vector<32x32xf32>
    %cst = arith.constant dense<0.000000e+00> : vector<16x32xf32>
    %2 = tpu.matmul %0, %1, %cst {dimension_numbers = #tpu.dot_dimension_numbers<[1], [0], [0], [1], [0, 0, 1, 1], [], []>} : vector<16x32xf32>, vector<32x32xf32>, vector<16x32xf32> -> vector<16x32xf32>
    %c0_3 = arith.constant 0 : index
    %c0_4 = arith.constant 0 : index
    %3 = vector.load %arg3[%c0_3, %c0_4] : memref<1x32xf32, #tpu.memory_space<vmem>>, vector<1x32xf32>
    %4 = vector.broadcast %3 : vector<1x32xf32> to vector<16x32xf32>
    %5 = arith.addf %2, %4 : vector<16x32xf32>
    %6 = math.tanh %5 : vector<16x32xf32>
    %c0_5 = arith.constant 0 : index
    %c0_6 = arith.constant 0 : index
    %7 = vector.load %arg4[%c0_5, %c0_6] : memref<32x16xf32, #tpu.memory_space<vmem>>, vector<32x16xf32>
    %cst_7 = arith.constant dense<0.000000e+00> : vector<16x16xf32>
    %8 = tpu.matmul %6, %7, %cst_7 {dimension_numbers = #tpu.dot_dimension_numbers<[1], [0], [0], [1], [0, 0, 1, 1], [], []>} : vector<16x32xf32>, vector<32x16xf32>, vector<16x16xf32> -> vector<16x16xf32>
    %cst_8 = arith.constant dense<0xFF800000> : vector<16xf32>
    %9 = vector.multi_reduction <maximumf>, %8, %cst_8 [1] : vector<16x16xf32> to vector<16xf32>
    %10 = vector.shape_cast %9 : vector<16xf32> to vector<16x1xf32>
    %11 = vector.broadcast %10 : vector<16x1xf32> to vector<16x16xf32>
    %12 = arith.subf %8, %11 : vector<16x16xf32>
    %13 = math.exp %12 : vector<16x16xf32>
    %cst_9 = arith.constant dense<0.000000e+00> : vector<16xf32>
    %14 = vector.multi_reduction <add>, %13, %cst_9 [1] : vector<16x16xf32> to vector<16xf32>
    %15 = vector.shape_cast %14 : vector<16xf32> to vector<16x1xf32>
    %16 = tpu.reciprocal %15 {approx = true} : vector<16x1xf32> -> vector<16x1xf32>
    %17 = vector.broadcast %16 : vector<16x1xf32> to vector<16x16xf32>
    %18 = arith.mulf %13, %17 : vector<16x16xf32>
    %c0_10 = arith.constant 0 : index
    %c0_11 = arith.constant 0 : index
    %19 = vector.load %arg5[%c0_10, %c0_11] : memref<16x128xf32, #tpu.memory_space<vmem>>, vector<16x128xf32>
    %cst_12 = arith.constant dense<0.000000e+00> : vector<16x128xf32>
    %20 = tpu.matmul %18, %19, %cst_12 {dimension_numbers = #tpu.dot_dimension_numbers<[1], [0], [0], [1], [0, 0, 1, 1], [], []>} : vector<16x16xf32>, vector<16x128xf32>, vector<16x128xf32> -> vector<16x128xf32>
    %c0_13 = arith.constant 0 : index
    %c0_14 = arith.constant 0 : index
    %21 = vector.load %arg6[%c0_13, %c0_14] : memref<16x128xf32, #tpu.memory_space<vmem>>, vector<16x128xf32>
    tpu.vector_store %arg6[%c0_13, %c0_14], %20 {strides = array<i32>} : memref<16x128xf32, #tpu.memory_space<vmem>>, vector<16x128xf32>,
    return
  }
  func.func @transform_0(%arg0: i32) -> (i32, i32) {
    %c0_i32 = arith.constant 0 : i32
    %c0_i32_0 = arith.constant 0 : i32
    return %arg0, %c0_i32 : i32, i32
  }
  func.func @transform_1(%arg0: i32) -> (i32, i32) {
    %c0_i32 = arith.constant 0 : i32
    %c0_i32_0 = arith.constant 0 : i32
    %c0_i32_1 = arith.constant 0 : i32
    return %c0_i32, %c0_i32_0 : i32, i32
  }
  func.func @transform_2(%arg0: i32) -> (i32, i32) {
    %c0_i32 = arith.constant 0 : i32
    %c0_i32_0 = arith.constant 0 : i32
    %c0_i32_1 = arith.constant 0 : i32
    return %c0_i32, %c0_i32_0 : i32, i32
  }
  func.func @transform_3(%arg0: i32) -> (i32, i32) {
    %c0_i32 = arith.constant 0 : i32
    %c0_i32_0 = arith.constant 0 : i32
    %c0_i32_1 = arith.constant 0 : i32
    return %c0_i32, %c0_i32_0 : i32, i32
  }
  func.func @transform_4(%arg0: i32) -> (i32, i32) {
    %c0_i32 = arith.constant 0 : i32
    %c0_i32_0 = arith.constant 0 : i32
    %c0_i32_1 = arith.constant 0 : i32
    return %c0_i32, %c0_i32_0 : i32, i32
  }
  func.func @transform_5(%arg0: i32) -> (i32, i32) {
    %c0_i32 = arith.constant 0 : i32
    %c0_i32_0 = arith.constant 0 : i32
    return %arg0, %c0_i32 : i32, i32
  }
}

</mosaic_0001>

<bundles_post_ra>
// kernel: tpu_custom_call.1
= control target key start
LH: loop header
LB: loop body
LE: loop exit
PB: predicated region body
PF: predicated region fallthrough
CT: control target
= control target key end

     0   :  { %10 = vsyncpa [#allocation3], 0  ;;  %s585_s0 = inlined_call_operand.vmem [shape: f32[16,32], index: 0, kind: input, shape index: {}]   ;;  %s586_s1 = inlined_call_operand.vmem [shape: f32[32,32], index: 1, kind: input, shape index: {}]   ;;  %s587_s2 = inlined_call_operand.vmem [shape: f32[1,32], index: 2, kind: input, shape index: {}]   ;;  %s588_s3 = inlined_call_operand.vmem [shape: f32[32,16], index: 3, kind: input, shape index: {}]   ;;  %s589_s4 = inlined_call_operand.hbm [shape: f32[16,128], index: 4, kind: input, shape index: {}]   ;;  %s590_s5 = inlined_call_operand.hbm [shape: f32[16,128], index: 5, kind: output, shape index: {}]  }
   0x1   :  { %11 = vsyncpa [#allocation4], 0  ;;  %s478_s18 = smov [#allocation2]   ;;  %s430_s22 = scalar_lea.hbm %s589_s4, 256 }
   0x2   :  { %s25_s19 = sshll.u32 %s478_s18, 4  ;;  %p431_p0 = scmp.ne.s32.totalorder %s589_s4, %s430_s22  ;;  %s26_s19 = int_to_ptr.vmem [resolvable:$true] %s25_s19 }
   0x3   :  { %p434_p1 = scmp.lt.u32.totalorder %s430_s22, %s589_s4 }
   0x5   :  { %p436_p2 = pnand %p434_p1, %p431_p0 }
   0x7   :  { %439 = shalt.err (!%p436_p2)
}
   0x8   :  { %s440_s27 = scalar_lea.vmem %s26_s19, 256  ;;  %p445_p4 = scmp.lt.s32.totalorder %s26_s19, %s26_s19 }
   0x9   :  { %p441_p3 = scmp.ne.s32.totalorder %s26_s19, %s440_s27  ;;  %p446_p5 = scmp.lt.s32.totalorder %s440_s27, %s440_s27 }
   0xb   :  { %p447_p6 = por %p446_p5, %p445_p4 }
   0xd   :  { %p448_p7 = pnand %p447_p6, %p441_p3 }
   0xf   :  { %451 = shalt.err (!%p448_p7)
}
  0x10   :  { %s479_s28 = smov 128   ;;  %s480_s29 = smov 8  }
  0x11   :  { %31 = dma.hbm_to_vmem [thread:$0]  %s589_s4, 256, %s26_s19, [#allocation3], %s479_s28, %s479_s28, %s480_s29  }
  0x12   :  { %474 = dma.done.wait [#allocation3], 256  }
  0x13   :  { %475 = vsyncadd [#allocation3], 4294967040  ;;  %vm48_vm0 = vcmask 261120   ;;  %v37_v0 = vld [vmem:[%s586_s1] sm:$0xff]  ;;  %v38_v1 = vld [vmem:[%s586_s1 + $0x8] sm:$0xff]  ;;  %vm217_vm1 = vcmask 130048  }
  0x14   :  { %v39_v2 = vld [vmem:[%s586_s1 + $0x10] sm:$0xff]  ;;  %v394_v3 = vpack.c.bf16 %v38_v1, %v37_v0  ;;  %v40_v4 = vld [vmem:[%s586_s1 + $0x18] sm:$0xff]  ;;  %v35_v5 = vld [vmem:[%s585_s0] sm:$0xff] }
  0x15   :  { %v398_v6 = vpack.c.bf16 %v40_v4, %v39_v2  ;;  %373 = vmatprep.mubr.msk.f32.mxu0 %vm48_vm0, %v35_v5  ;;  %v36_v7 = vld [vmem:[%s585_s0 + $0x8] sm:$0xff]  ;;  %v132_v8 = vld [vmem:[%s588_s3] sm:$0xff]  ;;  %v134_v10 = vld [vmem:[%s588_s3 + $0x10] sm:$0xff] }
  0x16   :  { %395 = vmatprep.subr.bf16.mxu0 %v394_v3  ;;  %v133_v9 = vld [vmem:[%s588_s3 + $0x8] sm:$0xff]  ;;  %v135_v12 = vld [vmem:[%s588_s3 + $0x18] sm:$0xff]  ;;  %v342_v14 = vld [vmem:[%s587_s2] ss:$0 sm:$0xff]  ;;  %s481_s2 = smov [#allocation5]  }
  0x17   :  { %397 = vmatpush3.bf16.msra.mxu0 %v394_v3  ;;  %v402_v11 = vpack.c.bf16 %v133_v9, %v132_v8  ;;  %v406_v13 = vpack.c.bf16 %v135_v12, %v134_v10  ;;  %v240_v35 = vld [vmem:[#allocation2] sm:$0xff]  ;;  %v241_v36 = vld [vmem:[#allocation2 + $0x8] sm:$0xff]  ;;  %s330_s3 = sshll.u32 %s481_s2, 4  ;;  %s331_s3 = int_to_ptr.vmem [resolvable:$true] %s330_s3 }
  0x18   :  { %399 = vmatprep.subr.bf16.mxu0 %v398_v6  ;;  %v410_v37 = vpack.c.bf16 %v241_v36, %v240_v35  ;;  %s452_s26 = scalar_lea.vmem %s331_s3, 256  ;;  %p457_p9 = scmp.lt.s32.totalorder %s331_s3, %s331_s3 }
  0x19   :  { %403 = vmatprep.subr.bf16.mxu1 %v402_v11  ;;  %p453_p8 = scmp.ne.s32.totalorder %s331_s3, %s452_s26  ;;  %p458_p10 = scmp.lt.s32.totalorder %s452_s26, %s452_s26 }
  0x1a   :  { %405 = vmatpush3.bf16.msra.mxu1 %v402_v11 }
  0x1b   :  { %401 = vmatpush3.bf16.msra.mxu0 %v398_v6  ;;  %407 = vmatprep.subr.bf16.mxu1 %v406_v13  ;;  %p459_p11 = por %p458_p10, %p457_p9 }
  0x1c   :  { %411 = vmatprep.subr.bf16.mxu0 %v410_v37 }
  0x1d   :  { %p460_p12 = pnand %p459_p11, %p453_p8 }
  0x1e   :  { %374 = vmatmul.mubr.msk.f32.vlgmr.msra.gmra.mrb[0].mxu0 %vm48_vm0, %v36_v7  ;;  %409 = vmatpush3.bf16.msra.mxu1 %v406_v13 }
  0x1f   :  { %413 = vmatpush3.bf16.msra.mxu0 %v410_v37 }
  0xf1   :  { %v375_v15 = vpop.f32.mrb[0].mxu0 }
  0xf2   :  { %v127_v16 = vadd.f32 %v375_v15, %v342_v14  ;;  %v121_v17 = vpop.f32.mrb[1].mxu0 }
  0xf3   :  { %v122_v18 = vadd.f32 %v342_v14, %v121_v17 }
  0xf5   :  { %418 = vtanh.f32 %v122_v18 }
  0xf6   :  { %420 = vtanh.f32 %v127_v16 }
  0xff   :  { %v419_v19 = vpop.eup %418 }
 0x100   :  { %v421_v20 = vpop.eup %420  ;;  %384 = vmatprep.mubr.msk.f32.mxu1 %vm48_vm0, %v419_v19 }
 0x101   :  { %385 = vmatmul.mubr.msk.f32.vlgmr.msra.gmra.mrb[0].mxu1 %vm48_vm0, %v421_v20 }
 0x1d4   :  { %v386_v21 = vpop.f32.mrb[0].mxu1 }
 0x1d5   :  { %v208_v22 = vpop.f32.mrb[1].mxu1  ;;  %v221_v24 = vsel %vm217_vm1, %v386_v21, -inf }
 0x1d6   :  { %v218_v23 = vsel %vm217_vm1, %v208_v22, -inf }
 0x1d7   :  { %219 = vmax.xlane.f32.xlu0 %v218_v23 }
 0x1db   :  { %222 = vmax.xlane.f32.xlu0 %v221_v24 }
 0x264   :  { %v220_v25 = vpop.xlane.xlu0 %219 }
 0x265   :  { %v224_v26 = vsub.f32 %v208_v22, %v220_v25 }
 0x267   :  { %v226_v27 = vmul.f32 1.442695, %v224_v26 }
 0x268   :  { %v223_v28 = vpop.xlane.xlu0 %222 }
 0x269   :  { %422 = vpow2.f32 %v226_v27  ;;  %v225_v29 = vsub.f32 %v386_v21, %v223_v28 }
 0x26b   :  { %v228_v30 = vmul.f32 1.442695, %v225_v29 }
 0x26d   :  { %424 = vpow2.f32 %v228_v30 }
 0x273   :  { %v423_v31 = vpop.eup %422 }
 0x274   :  { %v230_v32 = vsel %vm217_vm1, %v423_v31, 0.0 }
 0x275   :  { %231 = vadd.xlane.f32.xlu1 %v230_v32 }
 0x277   :  { %v425_v33 = vpop.eup %424 }
 0x278   :  { %v233_v34 = vsel %vm217_vm1, %v425_v33, 0.0 }
 0x279   :  { %234 = vadd.xlane.f32.xlu1 %v233_v34 }
 0x302   :  { %v232_v38 = vpop.xlane.xlu1 %231 }
 0x303   :  { %426 = vrcp.f32 %v232_v38 }
 0x306   :  { %v235_v39 = vpop.xlane.xlu1 %234 }
 0x307   :  { %428 = vrcp.f32 %v235_v39 }
 0x30d   :  { %v427_v40 = vpop.eup %426 }
 0x30e   :  { %v238_v41 = vmul.f32 %v427_v40, %v423_v31 }
 0x310   :  { %391 = vmatprep.mubr.msk.f32.mxu0 %vm217_vm1, %v238_v41 }
 0x311   :  { %v429_v42 = vpop.eup %428 }
 0x312   :  { %v239_v43 = vmul.f32 %v429_v42, %v425_v33 }
 0x314   :  { %392 = vmatmul.mubr.msk.f32.vlgmr.msra.gmra.mrb[2].mxu0 %vm217_vm1, %v239_v43 }
 0x3e7   :  { %v393_v44 = vpop.f32.mrb[2].mxu0 }
 0x3e8   :  { %324 = vst [vmem:[#allocation5 + $0x8] sm:$0xff] %v393_v44  ;;  %v314_v45 = vpop.f32.mrb[3].mxu0 }
 0x3e9   :  { %323 = vst [vmem:[#allocation5] sm:$0xff] %v314_v45 }
 0x3ea   :  { %463 = shalt.err (!%p460_p12)
}
 0x3eb   :  { %s464_s6 = scalar_lea.hbm %s590_s5, 256 }
 0x3ec   :  { %p465_p13 = scmp.ne.s32.totalorder %s590_s5, %s464_s6  ;;  %p468_p0 = scmp.lt.u32.totalorder %s464_s6, %s590_s5 }
 0x3ee   :  { %p470_p1 = pnand %p468_p0, %p465_p13 }
 0x3f0   :  { %473 = shalt.err (!%p470_p1)
}
 0x3f1   :  { %336 = dma.vmem_to_hbm [thread:$0]  %s331_s3, 256, %s590_s5, [#allocation4], %s479_s28, %s479_s28, %s480_s29  }
 0x3f2   :  { %476 = dma.done.wait [#allocation4], 256  }
 0x3f3   :  { %477 = vsyncadd [#allocation4], 4294967040 }
 0x3f4   :  { %340 = vsyncpa [#allocation3], 1 }
 0x3f5   :  { %341 = vsyncpa [#allocation4], 1 }

</bundles_post_ra>
